<compile_context>
chip_gen: v7x
topology: tpu7x:2x2x1
jax: 0.10.0
libtpu: 0.0.40
codegen_flags: <defaults>
</compile_context>

<pallas_src>
import jax
import jax.numpy as jnp
from jax.experimental import pallas as pl
from jax.experimental.pallas import tpu as pltpu


def _identity_copy_kernel(x_ref, o_ref):
    # Entire forward pass of `Quantization`: a VMEM tile copy.
    o_ref[...] = x_ref[...]


# Widest-first lane candidates: a wider lane-dense out slab = fewer grid steps
# and longer unmasked stores (the biggest measured store-side lever).
_LANE_CANDIDATES = (32768, 16384, 8192, 4096, 2048, 1024, 512, 256, 128)


def _choose_lanes(n):
    """Widest lane width (multiple of 128) that exactly divides n, else 0."""
    for lanes in _LANE_CANDIDATES:
        if n % lanes == 0:
            return lanes
    return 0


def _per_chip_tiling():
    """(target_block_bytes, vmem_limit_bytes or None) per TPU generation."""
    try:
        kind = jax.devices()[0].device_kind.lower()
    except Exception:
        kind = ""
    if "v6" in kind or "trillium" in kind:
        # v6e: 128 MiB physical VMEM -> 4 MiB tiles; raise the scoped limit so
        # (in + out) x 2 double-buffers (16 MiB) fit with headroom.
        return 4 * 1024 * 1024, 48 << 20
    # v5e (16 MiB scoped default) and v7x (64 MiB physical / 32 MiB scoped):
    # 2 MiB tiles keep (in + out) x 2 buffers at 8 MiB, safely inside budget,
    # while already sitting near the HBM roofline for a pure copy.
    return 2 * 1024 * 1024, None


def quantization_forward(encoded_and_cover, *, force_pallas_copy=False):
    """Pallas equivalent of Quantization.forward (identity on first tensor).

    Default: return the input unchanged -- the fastest correct implementation
    of an identity op (no kernel launch, no HBM traffic).  Set
    `force_pallas_copy=True` to run the explicit Pallas copy kernel (e.g. when
    a fresh output buffer is required).
    """
    encoded_image = encoded_and_cover[0]

    if not force_pallas_copy:
        # Highest-value optimization from the review: do not copy at all.
        return encoded_image

    orig_shape = encoded_image.shape
    dtype = encoded_image.dtype
    itemsize = jnp.dtype(dtype).itemsize
    n = encoded_image.size

    lanes = _choose_lanes(n)
    if n == 0 or lanes == 0:
        # TODO(synk): a ragged tail (n % 128 != 0) would need a masked
        # pltpu.store on the last grid step; since the op is an identity we
        # just return the input instead of paying extra HBM passes for padding.
        return encoded_image

    rows = n // lanes
    # Metadata-only reshape (contiguous row-major) -- no extra HBM pass.
    x2d = encoded_image.reshape(rows, lanes)

    # Sublane packing multiple per dtype: 8 (32-bit), 16 (16-bit), 32 (8-bit).
    sub = max(8, 32 // max(itemsize, 1))

    target_block_bytes, vmem_limit = _per_chip_tiling()
    tile_rows = max(sub, (target_block_bytes // (lanes * itemsize)) // sub * sub)
    if tile_rows >= rows:
        # Whole (small) slab as a single block: full-extent dims are always legal.
        tile_rows = rows
        grid = (1,)
    else:
        grid = (pl.cdiv(rows, tile_rows),)

    out2d = pl.pallas_call(
        _identity_copy_kernel,
        out_shape=jax.ShapeDtypeStruct((rows, lanes), dtype),
        grid_spec=pltpu.PrefetchScalarGridSpec(
            num_scalar_prefetch=0,
            grid=grid,
            in_specs=[pl.BlockSpec((tile_rows, lanes), lambda i: (i, 0))],
            out_specs=pl.BlockSpec((tile_rows, lanes), lambda i: (i, 0)),
        ),
        # Under jit with a donated input this reuses the input HBM buffer (no
        # fresh output allocation); outside jit XLA preserves the caller's copy.
        input_output_aliases={0: 0},
        compiler_params=pltpu.CompilerParams(
            dimension_semantics=("parallel",),
            vmem_limit_bytes=vmem_limit),
        cost_estimate=pl.CostEstimate(
            flops=0,
            transcendentals=0,
            bytes_accessed=2 * n * itemsize),
    )(x2d)

    return out2d.reshape(orig_shape)


if __name__ == "__main__":
    key = jax.random.PRNGKey(0)
    k1, k2 = jax.random.split(key)

    # Small NCHW shapes consistent with the module's usage (encoded, cover).
    encoded_image = jax.random.normal(k1, (2, 4, 16, 16), dtype=jnp.float32)
    cover_image = jax.random.normal(k2, (2, 4, 16, 16), dtype=jnp.float32)

    # Default fast path: identity short-circuit (no kernel, per review).
    out_fast = quantization_forward([encoded_image, cover_image])
    out_fast = jax.block_until_ready(out_fast)

    # Forced path: exercise the Pallas copy kernel once.
    out_kernel = quantization_forward([encoded_image, cover_image],
                                      force_pallas_copy=True)
    out_kernel = jax.block_until_ready(out_kernel)

    for out in (out_fast, out_kernel):
        assert out.shape == encoded_image.shape
        assert out.dtype == encoded_image.dtype
        assert bool(jnp.allclose(out, encoded_image))

    print("KERNEL_OK")
</pallas_src>

<mosaic_0001>
module attributes {stable_mosaic.version = 11 : i64} {
  func.func @_identity_copy_kernel(%arg0: i32, %arg1: memref<1x2048xf32, #tpu.memory_space<vmem>>, %arg2: memref<1x2048xf32, #tpu.memory_space<vmem>>) attributes {dimension_semantics = [#tpu.dimension_semantics<parallel>], iteration_bounds = array<i64: 1>, scalar_prefetch = 0 : i64, scratch_operands = 0 : i64, tpu.core_type = #tpu.core_type<tc>, window_params = [{transform_indices = @transform_0, window_bounds = array<i64: 1, 2048>}, {transform_indices = @transform_1, window_bounds = array<i64: 1, 2048>}]} {
    %c0 = arith.constant 0 : index
    %c0_0 = arith.constant 0 : index
    %0 = vector.load %arg1[%c0, %c0_0] : memref<1x2048xf32, #tpu.memory_space<vmem>>, vector<1x2048xf32>
    %c0_1 = arith.constant 0 : index
    %c0_2 = arith.constant 0 : index
    %1 = vector.load %arg2[%c0_1, %c0_2] : memref<1x2048xf32, #tpu.memory_space<vmem>>, vector<1x2048xf32>
    tpu.vector_store %arg2[%c0_1, %c0_2], %0 {strides = array<i32>} : memref<1x2048xf32, #tpu.memory_space<vmem>>, vector<1x2048xf32>,
    return
  }
  func.func @transform_0(%arg0: i32) -> (i32, i32) {
    %c0_i32 = arith.constant 0 : i32
    %c0_i32_0 = arith.constant 0 : i32
    return %arg0, %c0_i32 : i32, i32
  }
  func.func @transform_1(%arg0: i32) -> (i32, i32) {
    %c0_i32 = arith.constant 0 : i32
    %c0_i32_0 = arith.constant 0 : i32
    return %arg0, %c0_i32 : i32, i32
  }
}

</mosaic_0001>

<bundles_post_ra>
// kernel: tpu_custom_call.1
= control target key start
LH: loop header
LB: loop body
LE: loop exit
PB: predicated region body
PF: predicated region fallthrough
CT: control target
= control target key end

     0   :  { %6 = vsyncpa [#allocation3], 0  ;;  %s126_s0 = inlined_call_operand.hbm [shape: f32[1,2048], index: 0, kind: input, shape index: {}, may-alias: {0,1}]   ;;  %s127_s1 = inlined_call_operand.hbm [shape: f32[1,2048], index: 1, kind: output, shape index: {}, may-alias: {0,1}]  }
   0x1   :  { %7 = vsyncpa [#allocation4], 0  ;;  %s90_s6 = smov [#allocation2]   ;;  %s42_s10 = scalar_lea.hbm %s126_s0, 256 }
   0x2   :  { %s14_s7 = sshll.u32 %s90_s6, 4  ;;  %p43_p0 = scmp.ne.s32.totalorder %s126_s0, %s42_s10  ;;  %s15_s7 = int_to_ptr.vmem [resolvable:$true] %s14_s7 }
   0x3   :  { %p46_p1 = scmp.lt.u32.totalorder %s42_s10, %s126_s0 }
   0x5   :  { %p48_p2 = pnand %p46_p1, %p43_p0 }
   0x7   :  { %51 = shalt.err (!%p48_p2)
}
   0x8   :  { %s52_s15 = scalar_lea.vmem %s15_s7, 256  ;;  %p57_p4 = scmp.lt.s32.totalorder %s15_s7, %s15_s7 }
   0x9   :  { %p53_p3 = scmp.ne.s32.totalorder %s15_s7, %s52_s15  ;;  %p58_p5 = scmp.lt.s32.totalorder %s52_s15, %s52_s15 }
   0xb   :  { %p59_p6 = por %p58_p5, %p57_p4 }
   0xd   :  { %p60_p7 = pnand %p59_p6, %p53_p3 }
   0xf   :  { %63 = shalt.err (!%p60_p7)
}
  0x10   :  { %17 = dma.hbm_to_vmem [thread:$0]  %s126_s0, 256, %s15_s7, [#allocation3]  }
  0x11   :  { %86 = dma.done.wait [#allocation3], 256  }
  0x12   :  { %87 = vsyncadd [#allocation3], 4294967040  ;;  %s91_s18 = smov [#allocation5]   ;;  %v21_v0 = vld [vmem:[#allocation2] sm:$0xff]  ;;  %v22_v1 = vld [vmem:[#allocation2 + $0x8] sm:$0xff] }
  0x13   :  { %s31_s19 = sshll.u32 %s91_s18, 4  ;;  %23 = vst [vmem:[#allocation5] sm:$0xff] %v21_v0  ;;  %24 = vst [vmem:[#allocation5 + $0x8] sm:$0xff] %v22_v1  ;;  %s32_s19 = int_to_ptr.vmem [resolvable:$true] %s31_s19 }
  0x14   :  { %s64_s20 = scalar_lea.vmem %s32_s19, 256  ;;  %p69_p9 = scmp.lt.s32.totalorder %s32_s19, %s32_s19 }
  0x15   :  { %p65_p8 = scmp.ne.s32.totalorder %s32_s19, %s64_s20  ;;  %p70_p10 = scmp.lt.s32.totalorder %s64_s20, %s64_s20 }
  0x17   :  { %p71_p11 = por %p70_p10, %p69_p9 }
  0x19   :  { %p72_p12 = pnand %p71_p11, %p65_p8 }
  0x1b   :  { %75 = shalt.err (!%p72_p12)
}
  0x1c   :  { %s76_s0 = scalar_lea.hbm %s127_s1, 256 }
  0x1d   :  { %p77_p13 = scmp.ne.s32.totalorder %s127_s1, %s76_s0  ;;  %p80_p0 = scmp.lt.u32.totalorder %s76_s0, %s127_s1 }
  0x1f   :  { %p82_p1 = pnand %p80_p0, %p77_p13 }
  0x21   :  { %85 = shalt.err (!%p82_p1)
}
  0x22   :  { %34 = dma.vmem_to_hbm [thread:$0]  %s32_s19, 256, %s127_s1, [#allocation4]  }
  0x23   :  { %88 = dma.done.wait [#allocation4], 256  }
  0x24   :  { %89 = vsyncadd [#allocation4], 4294967040 }
  0x25   :  { %38 = vsyncpa [#allocation3], 1 }
  0x26   :  { %39 = vsyncpa [#allocation4], 1 }

</bundles_post_ra>
